<compile_context>
chip_gen: v6e
topology: v6e:2x2x1
jax: 0.10.0
libtpu: 0.0.40
codegen_flags: <defaults>
</compile_context>

<pallas_src>
import math

import jax
import jax.numpy as jnp
import numpy as np
from jax.experimental import pallas as pl
from jax.experimental.pallas import tpu as pltpu


def _round_up(x, m):
    return ((x + m - 1) // m) * m


def _mlp_meta_kernel(x_ref, w1_ref, w2_ref, o_ref):
    """One (batch-element, lane-tile) grid step.

    x_ref : (C, TL)        bf16  input channels x spatial lanes
    w1_ref: (hidden, C)    bf16  fc1 weight (1x1 conv == channel matmul)
    w2_ref: (O, hidden)    bf16  fc2 weight
    o_ref : (O, TL)        bf16  output
    """
    # fc1 on the MXU, f32 accumulation.
    h = jnp.dot(w1_ref[...], x_ref[...], preferred_element_type=jnp.float32)
    # SquaredReLU in bf16 on the VPU (halves the hidden intermediate's
    # vreg/VMEM footprint; v6e/v7x have a bf16 VPU).
    h = jnp.maximum(h, 0.0).astype(w2_ref.dtype)
    h = h * h
    # drop1: identity (drop=0.0 / inference).
    # fc2 on the MXU, bf16 operands, f32 accumulation.
    y = jnp.dot(w2_ref[...], h, preferred_element_type=jnp.float32)
    o_ref[...] = y.astype(o_ref.dtype)


def _vmem_estimate_bytes(C, hidden, O, tl, in_bytes, out_bytes):
    x_buf = 2 * C * tl * in_bytes                     # double-buffered input tile
    o_buf = 2 * O * tl * out_bytes                    # double-buffered output tile
    w_buf = 2 * (hidden * C + O * hidden) * in_bytes  # double-buffered weights
    h_tmp = hidden * tl * (4 + in_bytes)              # f32 fc1 result + bf16 square
    return x_buf + o_buf + w_buf + h_tmp


def mlp_meta_pallas(x, w1, w2, *, block_l=512, compute_dtype=jnp.bfloat16,
                    out_dtype=None):
    """Fused MetaFormer MLP forward.

    x : [N, C, H, W]   (NCHW, like the PyTorch module)
    w1: [hidden, C]    fc1 1x1-conv weight (squeezed)
    w2: [O, hidden]    fc2 1x1-conv weight (squeezed)
    returns [N, O, H, W] in `out_dtype` (default: compute_dtype = bf16).
    """
    N, C, H, W = x.shape
    hidden, Cw = w1.shape
    O, hw = w2.shape
    assert Cw == C and hw == hidden
    assert block_l % 128 == 0, "lane tile must be 128-aligned"

    if out_dtype is None:
        out_dtype = compute_dtype
    in_bytes = jnp.dtype(compute_dtype).itemsize
    out_bytes = jnp.dtype(out_dtype).itemsize

    # --- lane-tile selection --------------------------------------------------
    # Start from block_l and shrink until the per-step VMEM footprint fits a
    # v7x-safe budget (64 MiB physical, keep headroom). v5e/v6e (128 MiB) take
    # the same or larger tiles without issue.
    VMEM_BUDGET = 48 * 1024 * 1024
    tl = max(256, block_l)
    while tl > 256 and _vmem_estimate_bytes(C, hidden, O, tl, in_bytes,
                                            out_bytes) > VMEM_BUDGET:
        tl //= 2

    HW = H * W
    if HW <= tl:                       # small feature maps: a single lane tile
        tl = _round_up(max(HW, 128), 128)
    HWp = _round_up(HW, tl)            # lane-dense, 128-aligned, divisible by tl

    # --- wrapper-side layout (free for contiguous NCHW) -----------------------
    # [N, C, H, W] -> [N, C, H*W]; zero-pad lanes only if H*W is not already a
    # multiple of the lane tile (it usually is for vision feature maps).  Zero
    # pads are numerically safe: relu(0)^2 = 0 and bias=False.
    x3 = x.reshape(N, C, HW)
    if HWp != HW:
        x3 = jnp.pad(x3, ((0, 0), (0, 0), (0, HWp - HW)))
    x3 = x3.astype(compute_dtype)
    w1c = w1.astype(compute_dtype)
    w2c = w2.astype(compute_dtype)

    grid = (N, HWp // tl)

    vmem_need = _vmem_estimate_bytes(C, hidden, O, tl, in_bytes, out_bytes)
    cp_kwargs = dict(dimension_semantics=("parallel", "parallel"))
    if vmem_need > 32 * 1024 * 1024:   # above the default scoped VMEM limit
        cp_kwargs["vmem_limit_bytes"] = min(int(vmem_need * 1.25),
                                            60 * 1024 * 1024)

    out3 = pl.pallas_call(
        _mlp_meta_kernel,
        out_shape=jax.ShapeDtypeStruct((N, O, HWp), out_dtype),
        grid=grid,
        in_specs=[
            # activations: one batch element (squeezed) x one lane tile
            pl.BlockSpec((None, C, tl), lambda n, l: (n, 0, l)),
            # weights: tiny, resident across the whole grid
            pl.BlockSpec((hidden, C), lambda n, l: (0, 0)),
            pl.BlockSpec((O, hidden), lambda n, l: (0, 0)),
        ],
        out_specs=pl.BlockSpec((None, O, tl), lambda n, l: (n, 0, l)),
        compiler_params=pltpu.CompilerParams(**cp_kwargs),
    )(x3, w1c, w2c)

    if HWp != HW:
        out3 = out3[:, :, :HW]
    return out3.reshape(N, O, H, W)


class MlpMetaPallas:
    """JAX/Pallas port of Mlp_meta (bias=False, drop=0.0, act=SquaredReLU)."""

    def __init__(self, dim, mlp_ratio=4, out_features=None, drop=0.0,
                 bias=False, key=None):
        assert not bias, "bias=True path not implemented (module default False)"
        assert drop == 0.0, "training-mode dropout not implemented"
        out_features = out_features or dim
        hidden = int(mlp_ratio * dim)
        if key is None:
            key = jax.random.PRNGKey(0)
        k1, k2 = jax.random.split(key)
        # PyTorch Conv2d default init: U(-1/sqrt(fan_in), 1/sqrt(fan_in))
        b1 = 1.0 / math.sqrt(dim)       # fan_in of fc1 (1x1 conv) = dim
        b2 = 1.0 / math.sqrt(hidden)    # fan_in of fc2 = hidden
        self.w1 = jax.random.uniform(k1, (hidden, dim), jnp.float32, -b1, b1)
        self.w2 = jax.random.uniform(k2, (out_features, hidden), jnp.float32,
                                     -b2, b2)
        self.drop = drop  # identity at inference

    def __call__(self, x):
        return mlp_meta_pallas(x, self.w1, self.w2)


if __name__ == "__main__":
    key = jax.random.PRNGKey(0)
    kx, kw = jax.random.split(key)

    # small shapes consistent with the module: dim=8, mlp_ratio=4 -> hidden=32
    N, dim, H, W = 2, 8, 16, 16
    x = jax.random.normal(kx, (N, dim, H, W), jnp.float32)

    mod = MlpMetaPallas(dim, mlp_ratio=4, key=kw)

    out = jax.block_until_ready(mod(x))
    assert out.shape == (N, dim, H, W), out.shape

    # Reference mirroring the kernel math exactly (bf16 operands + bf16
    # SquaredReLU, f32 accumulation, bf16 output rounding absorbed by the
    # tolerance).  No transposes needed: 1x1 conv == channel matmul.
    C, O, L = dim, dim, H * W
    x2 = x.reshape(N, C, L).astype(jnp.bfloat16)
    h = jnp.einsum("hc,ncl->nhl", mod.w1.astype(jnp.bfloat16), x2,
                   preferred_element_type=jnp.float32)
    h = jnp.maximum(h, 0.0).astype(jnp.bfloat16)
    h = h * h
    y = jnp.einsum("oh,nhl->nol", mod.w2.astype(jnp.bfloat16), h,
                   preferred_element_type=jnp.float32)
    ref = y.reshape(N, O, H, W)

    got = np.asarray(out.astype(jnp.float32))
    want = np.asarray(ref)
    assert np.allclose(got, want, atol=2e-2, rtol=2e-2), \
        float(np.max(np.abs(got - want)))

    print("KERNEL_OK")
</pallas_src>

<mosaic_0001>
module attributes {stable_mosaic.version = 11 : i64} {
  func.func @_mlp_meta_kernel(%arg0: i32, %arg1: i32, %arg2: memref<1x8x256xbf16, #tpu.memory_space<vmem>>, %arg3: memref<32x8xbf16, #tpu.memory_space<vmem>>, %arg4: memref<8x32xbf16, #tpu.memory_space<vmem>>, %arg5: memref<1x8x256xbf16, #tpu.memory_space<vmem>>) attributes {dimension_semantics = [#tpu.dimension_semantics<parallel>, #tpu.dimension_semantics<parallel>], iteration_bounds = array<i64: 2, 1>, scalar_prefetch = 0 : i64, scratch_operands = 0 : i64, tpu.core_type = #tpu.core_type<tc>, window_params = [{transform_indices = @transform_0, window_bounds = array<i64: 1, 8, 256>}, {pipeline_mode = #tpu.pipeline_mode<synchronous>, transform_indices = @transform_1, window_bounds = array<i64: 32, 8>}, {pipeline_mode = #tpu.pipeline_mode<synchronous>, transform_indices = @transform_2, window_bounds = array<i64: 8, 32>}, {transform_indices = @transform_3, window_bounds = array<i64: 1, 8, 256>}]} {
    %c0 = arith.constant 0 : index
    %c0_0 = arith.constant 0 : index
    %0 = vector.load %arg3[%c0, %c0_0] : memref<32x8xbf16, #tpu.memory_space<vmem>>, vector<32x8xbf16>
    %c0_1 = arith.constant 0 : index
    %c0_2 = arith.constant 0 : index
    %c0_3 = arith.constant 0 : index
    %1 = vector.load %arg2[%c0_1, %c0_2, %c0_3] : memref<1x8x256xbf16, #tpu.memory_space<vmem>>, vector<1x8x256xbf16>
    %2 = vector.shape_cast %1 : vector<1x8x256xbf16> to vector<8x256xbf16>
    %cst = arith.constant dense<0.000000e+00> : vector<32x256xf32>
    %3 = tpu.matmul %0, %2, %cst {dimension_numbers = #tpu.dot_dimension_numbers<[1], [0], [0], [1], [0, 0, 1, 1], [], []>} : vector<32x8xbf16>, vector<8x256xbf16>, vector<32x256xf32> -> vector<32x256xf32>
    %cst_4 = arith.constant 0.000000e+00 : f32
    %4 = vector.broadcast %cst_4 : f32 to vector<32x256xf32>
    %5 = arith.maximumf %3, %4 : vector<32x256xf32>
    %6 = arith.truncf %5 : vector<32x256xf32> to vector<32x256xbf16>
    %7 = arith.mulf %6, %6 : vector<32x256xbf16>
    %c0_5 = arith.constant 0 : index
    %c0_6 = arith.constant 0 : index
    %8 = vector.load %arg4[%c0_5, %c0_6] : memref<8x32xbf16, #tpu.memory_space<vmem>>, vector<8x32xbf16>
    %cst_7 = arith.constant dense<0.000000e+00> : vector<8x256xf32>
    %9 = tpu.matmul %8, %7, %cst_7 {dimension_numbers = #tpu.dot_dimension_numbers<[1], [0], [0], [1], [0, 0, 1, 1], [], []>} : vector<8x32xbf16>, vector<32x256xbf16>, vector<8x256xf32> -> vector<8x256xf32>
    %10 = arith.truncf %9 : vector<8x256xf32> to vector<8x256xbf16>
    %c0_8 = arith.constant 0 : index
    %c0_9 = arith.constant 0 : index
    %c0_10 = arith.constant 0 : index
    %11 = vector.load %arg5[%c0_8, %c0_9, %c0_10] : memref<1x8x256xbf16, #tpu.memory_space<vmem>>, vector<1x8x256xbf16>
    %12 = vector.shape_cast %11 : vector<1x8x256xbf16> to vector<8x256xbf16>
    %13 = vector.shape_cast %10 : vector<8x256xbf16> to vector<1x8x256xbf16>
    tpu.vector_store %arg5[%c0_8, %c0_9, %c0_10], %13 {strides = array<i32>} : memref<1x8x256xbf16, #tpu.memory_space<vmem>>, vector<1x8x256xbf16>,
    return
  }
  func.func @transform_0(%arg0: i32, %arg1: i32) -> (i32, i32, i32) {
    %c0_i32 = arith.constant 0 : i32
    %c0_i32_0 = arith.constant 0 : i32
    return %arg0, %c0_i32, %arg1 : i32, i32, i32
  }
  func.func @transform_1(%arg0: i32, %arg1: i32) -> (i32, i32) {
    %c0_i32 = arith.constant 0 : i32
    %c0_i32_0 = arith.constant 0 : i32
    %c0_i32_1 = arith.constant 0 : i32
    return %c0_i32, %c0_i32_0 : i32, i32
  }
  func.func @transform_2(%arg0: i32, %arg1: i32) -> (i32, i32) {
    %c0_i32 = arith.constant 0 : i32
    %c0_i32_0 = arith.constant 0 : i32
    %c0_i32_1 = arith.constant 0 : i32
    return %c0_i32, %c0_i32_0 : i32, i32
  }
  func.func @transform_3(%arg0: i32, %arg1: i32) -> (i32, i32, i32) {
    %c0_i32 = arith.constant 0 : i32
    %c0_i32_0 = arith.constant 0 : i32
    return %arg0, %c0_i32, %arg1 : i32, i32, i32
  }
}

</mosaic_0001>

<bundles_post_ra>
// kernel: tpu_custom_call.1
= control target key start
LH: loop header
LB: loop body
LE: loop exit
PB: predicated region body
PF: predicated region fallthrough
CT: control target
= control target key end

     0   :  { %8 = vsyncpa [#allocation3], 0  ;;  %s757_s0 = inlined_call_operand.vmem [shape: bf16[2,8,256], index: 0, kind: input, shape index: {}]   ;;  %s758_s1 = inlined_call_operand.vmem [shape: bf16[32,8], index: 1, kind: input, shape index: {}]   ;;  %s759_s2 = inlined_call_operand.vmem [shape: bf16[8,32], index: 2, kind: input, shape index: {}]   ;;  %s760_s3 = inlined_call_operand.hbm [shape: bf16[2,8,256], index: 3, kind: output, shape index: {}]  }
   0x1   :  { %10 = vsyncpa [#allocation3 + $0x1], 0  ;;  %s637_s12 = smov 0   ;;  %s639_s13 = smov 0  }
   0x2   :  { %s641_s14 = smov 0   ;;  %s643_s15 = smov 0  }
   0x3   :  { %s645_s16 = smov 0   ;;  %s647_s17 = smov 0  }
   0x4 LB: > { %s452_s18 = sadd.s32 4294967295, %s613_s17   ;;  %s453_s19 = sadd.s32 4294967294, %s613_s17   ;;  %s613_s17 = sphi %s647_s17, %s16_s17   ;;  %s609_s16 = sphi %s645_s16, %s767_s16   ;;  %s605_s15 = sphi %s643_s15, %s766_s15   ;;  %s601_s14 = sphi %s641_s14, %s765_s14   ;;  %s597_s13 = sphi %s639_s13, %s764_s13   ;;  %s593_s12 = sphi %s637_s12, %s763_s12  }
   0x5   : > { %s28_s20 = sadd.s32 1, %s609_s16  ;;  %s107_s21 = sadd.s32 1, %s601_s14 }
   0x6   : > { %p30_p0 = scmp.ge.s32.totalorder %s28_s20, 2  ;;  %p117_p1 = scmp.ne.s32.totalorder %s601_s14, %s597_s13 }
   0x7   : > { %p118_p2 = scmp.eq.s32.totalorder %s452_s18, 1  ;;  %p123_p3 = scmp.ne.s32.totalorder %s597_s13, %s593_s12 }
   0x8   : > { %s769_s20 = smov (%p30_p0, %s28_s20), 0  ;;  %p124_p5 = scmp.eq.s32.totalorder %s453_s19, 1 }
   0x9   : > { %p677_p4 = por %p118_p2, %p117_p1  ;;  %s102_s23 = ssub.s32 %s609_s16, %s769_s20 }
   0xa   : > { %p456_p6 = scmp.ge.s32.totalorder %s613_s17, 1  ;;  %p105_p7 = scmp.eq.s32.totalorder %s102_s23, 0 }
   0xb   : > { %p684_p8 = por %p124_p5, %p123_p3  ;;  %p161_p9 = scmp.lt.s32.totalorder %s613_s17, 3 }
   0xc   : > { %s690_s25 = scalar_select %p105_p7, %s601_s14, %s107_s21  }
   0xd   : > { %p162_p10 = pnand %p456_p6, %p161_p9 }
   0xe   : > { %p190_p11 = scmp.lt.s32.totalorder (!%p162_p10), %s605_s15, 1  ;;  %s186_s10 = sand.u32 (!%p162_p10), 1, %s597_s13  }
   0xf   : > { %165 = sbr.rel (%p162_p10) target bundleno = 463 (0x1cf), region = 32  ;;  %s457_s11 = sshll.u32 (!%p162_p10), %s186_s10, 3 }
  0x10   : > { %s476_s18 = sshll.u32 (!%p162_p10), %s605_s15, 7  ;;  %s188_s19 = scalar_lea.vmem (!%p162_p10), [#allocation2], %s457_s11 }
  0x11   : > { %s376_s21 = sshll.u32 (!%p162_p10), %s188_s19, 4  ;;  %s360_s28 = scalar_lea.sflag (!%p162_p10), [#allocation3], %s186_s10  ;;  %s713_s21 = int_to_ptr.vmem [resolvable:$true] %s376_s21 }
  0x12   : > { %s537_s29 = scalar_lea.vmem (!%p162_p10), %s713_s21, 128 }
  0x13   : > { %p538_p12 = scmp.ne.s32.totalorder (!%p162_p10), %s713_s21, %s537_s29 }
  0x14   : > { %v615_v0 = vmov 0   ;;  %s191_s26 = scalar_select %p190_p11, %s605_s15, 1  ;;  %vm228_vm0 = vcmask 1043456   ;;  %v535_v5 = vld [vmem:[%s758_s1] sm:$0xff]   ;;  %vm221_vm1 = vcmask 64512   ;;  %v536_v6 = vld [vmem:[%s758_s1 + $0x8] sm:$0xff]  }
  0x15   : > { %267 = vmatprep.mubr.bf16.mxu0 %v615_v0  ;;  %341 = vmatprep.mubr.bf16.mxu1 %v615_v0  ;;  %v304_v31 = vld [vmem:[%s759_s2] sm:$0xf]  ;;  %vm305_vm2 = vcmask 261120   ;;  %p539_p13 = pnand %p538_p12, %p677_p4  ;;  %s616_s15 = smov [#allocation2]  }
  0x16   : > { %s474_s27 = sshll.u32 %s191_s26, 3 }
  0x17   : > { %s197_s30 = scalar_lea.vmem %s757_s0, %s474_s27  ;;  %s711_s27 = scalar_lea.hbm %s760_s3, %s476_s18 }
  0x18   : > { %v205_v1 = vld [vmem:[%s197_s30] sm:$0xff]  ;;  %p540_p0 = pneg %p539_p13  ;;  %s541_s30 = sshll.u32 %s616_s15, 4  ;;  %s542_s30 = int_to_ptr.vmem [resolvable:$false] %s541_s30 }
  0x19   : > { %v463_v2 = vcombine.high %v205_v1, %v205_v1  ;;  %v462_v3 = vcombine.low %v205_v1, %v205_v1  ;;  %s543_s4 = scalar_lea.vmem %s542_s30, 256  ;;  %p544_p1 = scmp.lt.s32.totalorder %s713_s21, %s542_s30 }
  0x1a   : > { %p545_p2 = scmp.lt.s32.totalorder %s543_s4, %s537_s29 }
  0x1b   : > { %464 = vmatprep.subr.msk.bf16.mxu0 %vm228_vm0, %v463_v2  ;;  %v230_v4 = vsel %vm228_vm0, %v462_v3, 0 }
  0x1c   : > { %250 = vmatpush1.bf16.msra.mxu0 %v230_v4  ;;  %p546_p3 = por %p545_p2, %p544_p1 }
  0x1e   : > { %p547_p5 = pnand %p546_p3, %p540_p0 }
  0x1f   : > { %465 = vmatmul.mubr.msk.bf16.vlgmr.msra.gmra.mxu0 %vm221_vm1, %v535_v5 }
  0x20   : > { %277 = vmatprep.mubr.bf16.mxu0 %v615_v0 }
  0x27   : > { %466 = vmatmul.mubr.msk.bf16.gmra.mxu0 %vm221_vm1, %v536_v6 }
  0xdf   : > { %v269_v7 = vpop.f32.mrf.mxu0 }
  0xe0   : > { %v288_v25 = vmax.f32 %v269_v7, 0.0 }
  0xe1   : > { %v271_v8 = vpop.f32.mrf.mxu0 }
  0xe2   : > { %v289_v18 = vmax.f32 %v271_v8, 0.0 }
  0xe3   : > { %v273_v9 = vpop.f32.mrf.mxu0 }
  0xe4   : > { %v290_v21 = vmax.f32 %v273_v9, 0.0 }
  0xe5   : > { %v275_v10 = vpop.f32.mrf.mxu0 }
  0xe6   : > { %v291_v14 = vmax.f32 %v275_v10, 0.0  ;;  %v296_v27 = vpack.c.bf16 %v290_v21, %v288_v25 }
  0xe7   : > { %v279_v11 = vpop.f32.mrf.mxu0 }
  0xe8   : > { %v292_v16 = vmax.f32 %v279_v11, 0.0  ;;  %v297_v23 = vpack.c.bf16 %v291_v14, %v289_v18  ;;  %v300_v30 = vmul.bf16 %v296_v27, %v296_v27 }
  0xe9   : > { %v281_v12 = vpop.f32.mrf.mxu0 }
  0xea   : > { %v293_v19 = vmax.f32 %v281_v12, 0.0  ;;  %v301_v29 = vmul.bf16 %v297_v23, %v297_v23 }
  0xeb   : > { %v283_v13 = vpop.f32.mrf.mxu0 }
  0xec   : > { %v294_v15 = vmax.f32 %v283_v13, 0.0 }
  0xed   : > { %v285_v17 = vpop.f32.mrf.mxu0 }
  0xee   : > { %v295_v20 = vmax.f32 %v285_v17, 0.0  ;;  %v298_v22 = vpack.c.bf16 %v294_v15, %v292_v16 }
  0xf0   : > { %v299_v24 = vpack.c.bf16 %v295_v20, %v293_v19  ;;  %v302_v28 = vmul.bf16 %v298_v22, %v298_v22 }
  0xf2   : > { %v303_v26 = vmul.bf16 %v299_v24, %v299_v24 }
  0xf4   : > { %321 = vmatprep.subr.bf16.mxu1 %v303_v26 }
  0xf5   : > { %322 = vmatpush1.bf16.msra.mxu1 %v302_v28 }
  0xf6   : > { %323 = vmatprep.subr.bf16.mxu1 %v301_v29 }
  0xf9   : > { %324 = vmatpush1.bf16.msra.mxu1 %v300_v30 }
  0xfc   : > { %467 = vmatmul.mubr.msk.bf16.vlgmr.msra.gmra.mxu1 %vm305_vm2, %v304_v31 }
 0x1bc   : > { %v343_v32 = vpop.f32.mrf.mxu1 }
 0x1be   : > { %v345_v33 = vpop.f32.mrf.mxu1 }
 0x1bf   : > { %v475_v34 = vpack.c.bf16 %v345_v33, %v343_v32 }
 0x1c0   : > { %v347_v35 = vpop.f32.mrf.mxu1 }
 0x1c1   : > { %358 = vst [vmem:[%s188_s19] sm:$0xff] %v475_v34 }
 0x1c2   : > { %v348_v36 = vpop.f32.mrf.mxu1 }
 0x1c3   : > { %550 = shalt.err (!%p547_p5)
}
 0x1c4   : > { %s551_s5 = scalar_lea.hbm %s711_s27, 128  ;;  %s555_s8 = scalar_lea.hbm %s760_s3, 256 }
 0x1c5   : > { %p552_p6 = scmp.ne.s32.totalorder %s711_s27, %s551_s5  ;;  %p556_p10 = scmp.lt.s32.totalorder %s711_s27, %s760_s3 }
 0x1c6   : > { %p557_p11 = scmp.lt.s32.totalorder %s555_s8, %s551_s5 }
 0x1c7   : > { %p553_p7 = pnand %p552_p6, %p677_p4 }
 0x1c8   : > { %p558_p12 = por %p557_p11, %p556_p10 }
 0x1c9   : > { %p554_p9 = pneg %p553_p7 }
 0x1cb   : > { %p559_p13 = pnand %p558_p12, %p554_p9 }
 0x1cd   : > { %562 = shalt.err (!%p559_p13)
}
 0x1ce   : > { %477 = dma.vmem_to_hbm [thread:$0]  (%p677_p4), %s713_s21, 128, %s711_s27, %s360_s28  }
 0x1cf PF: > { %p483_p0 = scmp.ge.s32.totalorder %s613_s17, 2  ;;  %s388_s11 = sand.u32 1, %s593_s12  }
 0x1d0   : > { %s389_s18 = scalar_lea.sflag [#allocation3], %s388_s11 }
 0x1d1   : > { %p480_p1 = pnand %p483_p0, %p684_p8 }
 0x1d3   : > { %p481_p2 = pneg %p480_p1 }
 0x1d5   : > { %588 = dma.done.wait (%p481_p2), %s389_s18, 128  }
 0x1d6   : > { %590 = vsyncadd (%p481_p2), %s389_s18, 4294967168  ;;  %s16_s17 = sadd.s32 1, %s613_s17   ;;  %s763_s12 = smov %s597_s13 }
 0x1d7   : > { %p13_p3 = scmp.ge.s32.totalorder %s16_s17, 4   ;;  %s764_s13 = smov %s601_s14 }
 0x1d8   : > { %s765_s14 = smov %s690_s25  ;;  %s766_s15 = smov %s609_s16 }
 0x1d9   : > { %s767_s16 = smov %s769_s20  ;;  %15 = sbr.rel (!%p13_p3) target bundleno = 4 (0x4), region = 67 }
 0x1de   :  { %394 = vsyncpa [#allocation3], 1 }
 0x1df   :  { %396 = vsyncpa [#allocation3 + $0x1], 1 }

</bundles_post_ra>
